<compile_context>
chip_gen: v7x
topology: tpu7x:2x2x1
jax: 0.10.0
libtpu: 0.0.40
codegen_flags: <defaults>
</compile_context>

<pallas_src>
import functools

import jax
import jax.numpy as jnp
from jax.experimental import pallas as pl
from jax.experimental.pallas import tpu as pltpu


def _img_disc_kernel(tgt_ref, x_ref, w1_ref, w2_ref, w3_ref, loss_ref,
                     pooled_acc, *, num_pixels, tile_pixels, mask_tail,
                     focal_alpha):
    # tgt_ref   : (1,)      int32 SMEM scalar (0 = source, 1 = target)
    # x_ref     : (C, TP)   f32   current batch element, spatial tile (lanes = pixels)
    # w1_ref    : (C2, C)   bf16  1x1 conv #1
    # w2_ref    : (C4, C2)  bf16  1x1 conv #2
    # w3_ref    : (C4, 1)   f32   1x1 conv #3 (final projection, VPU path)
    # loss_ref  : (1, 1)    f32   per-sample loss (written on last spatial step)
    # pooled_acc: (C4, 1)   f32   per-sample spatial-sum accumulator (VMEM scratch)
    j = pl.program_id(1)
    nj = pl.num_programs(1)

    @pl.when(j == 0)
    def _():
        pooled_acc[...] = jnp.zeros_like(pooled_acc)

    x = x_ref[...]                                               # (C, TP) f32
    if mask_tail:
        # Tiled fallback whose last tile overruns H*W: zero the garbage lanes.
        # Exact because convs have no bias and are followed by ReLU.
        pix = j * tile_pixels + jax.lax.broadcasted_iota(jnp.int32, x.shape, 1)
        x = jnp.where(pix < num_pixels, x, 0.0)
    xb = x.astype(jnp.bfloat16)                                  # in-kernel cast

    # 1x1 conv -> ReLU -> 1x1 conv -> ReLU on the (channels, pixels) tile.
    h1 = jnp.maximum(
        jnp.dot(w1_ref[...], xb, preferred_element_type=jnp.float32),
        0.0).astype(jnp.bfloat16)                                # fused ReLU + downcast
    h2 = jnp.maximum(
        jnp.dot(w2_ref[...], h1, preferred_element_type=jnp.float32),
        0.0)                                                     # (C4, TP) f32

    # AdaptiveAvgPool2d((1,1)): accumulate spatial sums.
    pooled_acc[...] += jnp.sum(h2, axis=1, keepdims=True)        # (C4, 1)

    @pl.when(j == nj - 1)
    def _():
        # Mean pool, final 1x1 conv as VPU mul + sublane reduce, sigmoid focal loss.
        pooled = pooled_acc[...] * (1.0 / num_pixels)            # (C4, 1)
        logit = jnp.sum(pooled * w3_ref[...], axis=0, keepdims=True)  # (1, 1)
        t = tgt_ref[0].astype(jnp.float32)
        p = jax.nn.sigmoid(logit)
        # binary_cross_entropy_with_logits, numerically stable form
        ce = (jnp.maximum(logit, 0.0) - logit * t
              + jnp.log1p(jnp.exp(-jnp.abs(logit))))
        p_t = p * t + (1.0 - p) * (1.0 - t)
        alpha_t = focal_alpha * t + (1.0 - focal_alpha) * (1.0 - t)
        one_m = 1.0 - p_t
        loss_ref[...] = alpha_t * ce * (one_m * one_m)           # gamma = 2 -> square


# Budget sized so the full-sample block + intermediates fit comfortably on every
# generation (v7x has only 64 MiB physical VMEM per TensorCore).
_VMEM_TILE_BUDGET = 32 * 1024 * 1024


def _choose_spatial_tile(C, C2, C4, P, override=None):
    """Return (tile_pixels, n_tiles, mask_tail)."""
    if override is not None:
        tp = override
        n_tiles = -(-P // tp)
        return tp, n_tiles, (P % tp) != 0
    # Resident bytes per pixel column: double-buffered f32 x block, its bf16 copy,
    # f32+bf16 h1, f32 h2.
    per_pixel = 2 * C * 4 + C * 2 + C2 * (4 + 2) + C4 * 4
    if per_pixel * P <= _VMEM_TILE_BUDGET:
        return P, 1, False            # whole sample: one contiguous DMA, no carry
    tp = (_VMEM_TILE_BUDGET // per_pixel) // 128 * 128
    tp = max(128, min(tp, 8192))
    n_tiles = -(-P // tp)
    return tp, n_tiles, (P % tp) != 0


def img_discriminator_loss(x_nchw, w1, w2, w3, *, domain_target=False, alpha=1.0,
                           spatial_tile=None):
    """Forward of ImgDiscriminator.

    x_nchw : (B, C, H, W)      float32, PyTorch NCHW input.
    w1     : (C//2, C, 1, 1)   conv weights (PyTorch OIHW layout)
    w2     : (C//4, C//2, 1, 1)
    w3     : (1, C//4, 1, 1)
    spatial_tile : optional multiple-of-128 override of the spatial tile (testing).
    """
    del alpha  # GradReverse is the identity in the forward pass
    B, C, H, W = x_nchw.shape
    C2 = w1.shape[0]
    C4 = w2.shape[0]
    P = H * W
    TP, n_tiles, mask_tail = _choose_spatial_tile(C, C2, C4, P, spatial_tile)

    # Native NCHW layout viewed as (B, C, H*W); no pad, no cast (cast is in-kernel).
    x3 = x_nchw.reshape(B, C, P)
    w1m = w1.reshape(C2, C).astype(jnp.bfloat16)     # (C2, C)
    w2m = w2.reshape(C4, C2).astype(jnp.bfloat16)    # (C4, C2)
    w3m = w3.reshape(1, C4).T.astype(jnp.float32)    # (C4, 1), f32 VPU path
    tgt = jnp.array([1 if domain_target else 0], dtype=jnp.int32)

    kernel = functools.partial(
        _img_disc_kernel,
        num_pixels=P,            # true pixel count (masked/zero lanes contribute 0)
        tile_pixels=TP,
        mask_tail=mask_tail,
        focal_alpha=0.25,
    )

    grid_spec = pltpu.PrefetchScalarGridSpec(
        num_scalar_prefetch=1,
        grid=(B, n_tiles),
        in_specs=[
            pl.BlockSpec((None, C, TP), lambda b, j, tgt: (b, 0, j)),   # x tile
            pl.BlockSpec((C2, C), lambda b, j, tgt: (0, 0)),            # w1 (resident)
            pl.BlockSpec((C4, C2), lambda b, j, tgt: (0, 0)),           # w2 (resident)
            pl.BlockSpec((C4, 1), lambda b, j, tgt: (0, 0)),            # w3 (resident)
        ],
        out_specs=pl.BlockSpec((None, 1, 1), lambda b, j, tgt: (b, 0, 0)),
        scratch_shapes=[
            pltpu.VMEM((C4, 1), jnp.float32),   # pooled spatial-sum accumulator
        ],
    )

    per_sample = pl.pallas_call(
        kernel,
        out_shape=jax.ShapeDtypeStruct((B, 1, 1), jnp.float32),
        grid_spec=grid_spec,
        compiler_params=pltpu.CompilerParams(
            # Batch is independent (per-sample loss output) -> parallel (megacore on
            # v7x); the spatial axis carries pooled_acc -> arbitrary.
            dimension_semantics=("parallel", "arbitrary"),
            vmem_limit_bytes=48 * 1024 * 1024,
        ),
    )(tgt, x3, w1m, w2m, w3m)

    # reduction='mean' over the (B, 1) flattened logits (tiny B-element reduce).
    return {"loss_image_d": jnp.mean(per_sample[:, 0, 0])}


def _reference_loss(x_nchw, w1, w2, w3, domain_target):
    """Pure-JAX f32 reference of the PyTorch forward (for verification)."""
    B, C, H, W = x_nchw.shape
    C2, C4 = w1.shape[0], w2.shape[0]
    x = x_nchw.reshape(B, C, H * W).astype(jnp.float32)
    h1 = jnp.maximum(jnp.einsum("oc,bcp->bop", w1.reshape(C2, C), x), 0.0)
    h2 = jnp.maximum(jnp.einsum("oc,bcp->bop", w2.reshape(C4, C2), h1), 0.0)
    pooled = h2.mean(axis=2)                          # (B, C4)
    logits = pooled @ w3.reshape(1, C4).T             # (B, 1)
    t = jnp.float32(1.0 if domain_target else 0.0)
    p = jax.nn.sigmoid(logits)
    ce = jnp.maximum(logits, 0.0) - logits * t + jnp.log1p(jnp.exp(-jnp.abs(logits)))
    p_t = p * t + (1.0 - p) * (1.0 - t)
    alpha_t = 0.25 * t + 0.75 * (1.0 - t)
    return jnp.mean(alpha_t * ce * (1.0 - p_t) ** 2)


if __name__ == "__main__":
    # Small shapes consistent with the module (in_feature divisible by 4).
    B, C, H, W = 2, 32, 24, 24
    C2, C4 = C // 2, C // 4

    key = jax.random.PRNGKey(0)
    kx, k1, k2, k3 = jax.random.split(key, 4)
    x = jax.random.normal(kx, (B, C, H, W), dtype=jnp.float32)
    # torch.nn.init.normal_(w, mean=0.0, std=0.01)
    w1 = 0.01 * jax.random.normal(k1, (C2, C, 1, 1), dtype=jnp.float32)
    w2 = 0.01 * jax.random.normal(k2, (C4, C2, 1, 1), dtype=jnp.float32)
    w3 = 0.01 * jax.random.normal(k3, (1, C4, 1, 1), dtype=jnp.float32)

    # Full-sample spatial block (grid = (B, 1)), source domain.
    out = img_discriminator_loss(x, w1, w2, w3, domain_target=False, alpha=1.0)
    loss_s = jax.block_until_ready(out["loss_image_d"])
    ref_s = _reference_loss(x, w1, w2, w3, False)
    assert jnp.allclose(loss_s, ref_s, rtol=2e-3, atol=1e-5), (loss_s, ref_s)

    # domain_target=True branch (same compiled kernel, SMEM scalar flips).
    out_t = img_discriminator_loss(x, w1, w2, w3, domain_target=True)
    loss_t = jax.block_until_ready(out_t["loss_image_d"])
    ref_t = _reference_loss(x, w1, w2, w3, True)
    assert jnp.allclose(loss_t, ref_t, rtol=2e-3, atol=1e-5), (loss_t, ref_t)

    # Forced spatial tiling (P=576 -> 5 tiles of 128, tail masked) to exercise the
    # pooled-accumulator carry and the tail-mask path used for huge feature maps.
    out_tiled = img_discriminator_loss(x, w1, w2, w3, domain_target=False,
                                       spatial_tile=128)
    loss_tiled = jax.block_until_ready(out_tiled["loss_image_d"])
    assert jnp.allclose(loss_tiled, ref_s, rtol=2e-3, atol=1e-5), (loss_tiled, ref_s)

    # TODO(synk): GradReverse backward (gradient negation) is autograd-only; forward is identity.
    print("KERNEL_OK")
</pallas_src>

<mosaic_0001>
module attributes {stable_mosaic.version = 11 : i64} {
  func.func @_img_disc_kernel(%arg0: i32, %arg1: i32, %arg2: memref<1xi32, #tpu.memory_space<smem>>, %arg3: memref<1x32x576xf32, #tpu.memory_space<vmem>>, %arg4: memref<16x32xbf16, #tpu.memory_space<vmem>>, %arg5: memref<8x16xbf16, #tpu.memory_space<vmem>>, %arg6: memref<8x1xf32, #tpu.memory_space<vmem>>, %arg7: memref<1x1x1xf32, #tpu.memory_space<vmem>>, %arg8: memref<8x1xf32, #tpu.memory_space<vmem>>) attributes {dimension_semantics = [#tpu.dimension_semantics<parallel>, #tpu.dimension_semantics<arbitrary>], iteration_bounds = array<i64: 2, 1>, scalar_prefetch = 1 : i64, scratch_operands = 1 : i64, tpu.core_type = #tpu.core_type<tc>, window_params = [{transform_indices = @transform_0, window_bounds = array<i64: 1, 32, 576>}, {pipeline_mode = #tpu.pipeline_mode<synchronous>, transform_indices = @transform_1, window_bounds = array<i64: 16, 32>}, {pipeline_mode = #tpu.pipeline_mode<synchronous>, transform_indices = @transform_2, window_bounds = array<i64: 8, 16>}, {pipeline_mode = #tpu.pipeline_mode<synchronous>, transform_indices = @transform_3, window_bounds = array<i64: 8, 1>}, {transform_indices = @transform_4, window_bounds = array<i64: 1, 1, 1>}]} {
    %c0_i32 = arith.constant 0 : i32
    %0 = arith.cmpi eq, %arg1, %c0_i32 : i32
    %1 = arith.extui %0 : i1 to i32
    %c0_i32_0 = arith.constant 0 : i32
    %2 = arith.cmpi ne, %1, %c0_i32_0 : i32
    scf.if %2 {
      %cst_17 = arith.constant 0.000000e+00 : f32
      %23 = vector.broadcast %cst_17 : f32 to vector<8x1xf32>
      %c0_18 = arith.constant 0 : index
      %c0_19 = arith.constant 0 : index
      %24 = vector.load %arg8[%c0_18, %c0_19] : memref<8x1xf32, #tpu.memory_space<vmem>>, vector<8x1xf32>
      tpu.vector_store %arg8[%c0_18, %c0_19], %23 {strides = array<i32>} : memref<8x1xf32, #tpu.memory_space<vmem>>, vector<8x1xf32>,
    } else {
    }
    %c0 = arith.constant 0 : index
    %c0_1 = arith.constant 0 : index
    %c0_2 = arith.constant 0 : index
    %3 = vector.load %arg3[%c0, %c0_1, %c0_2] : memref<1x32x576xf32, #tpu.memory_space<vmem>>, vector<1x32x576xf32>
    %4 = vector.shape_cast %3 : vector<1x32x576xf32> to vector<32x576xf32>
    %5 = arith.truncf %4 : vector<32x576xf32> to vector<32x576xbf16>
    %c0_3 = arith.constant 0 : index
    %c0_4 = arith.constant 0 : index
    %6 = vector.load %arg4[%c0_3, %c0_4] : memref<16x32xbf16, #tpu.memory_space<vmem>>, vector<16x32xbf16>
    %cst = arith.constant dense<0.000000e+00> : vector<16x576xf32>
    %7 = tpu.matmul %6, %5, %cst {dimension_numbers = #tpu.dot_dimension_numbers<[1], [0], [0], [1], [0, 0, 1, 1], [], []>} : vector<16x32xbf16>, vector<32x576xbf16>, vector<16x576xf32> -> vector<16x576xf32>
    %cst_5 = arith.constant 0.000000e+00 : f32
    %8 = vector.broadcast %cst_5 : f32 to vector<16x576xf32>
    %9 = arith.maximumf %7, %8 : vector<16x576xf32>
    %10 = arith.truncf %9 : vector<16x576xf32> to vector<16x576xbf16>
    %c0_6 = arith.constant 0 : index
    %c0_7 = arith.constant 0 : index
    %11 = vector.load %arg5[%c0_6, %c0_7] : memref<8x16xbf16, #tpu.memory_space<vmem>>, vector<8x16xbf16>
    %cst_8 = arith.constant dense<0.000000e+00> : vector<8x576xf32>
    %12 = tpu.matmul %11, %10, %cst_8 {dimension_numbers = #tpu.dot_dimension_numbers<[1], [0], [0], [1], [0, 0, 1, 1], [], []>} : vector<8x16xbf16>, vector<16x576xbf16>, vector<8x576xf32> -> vector<8x576xf32>
    %cst_9 = arith.constant 0.000000e+00 : f32
    %13 = vector.broadcast %cst_9 : f32 to vector<8x576xf32>
    %14 = arith.maximumf %12, %13 : vector<8x576xf32>
    %c0_10 = arith.constant 0 : index
    %c0_11 = arith.constant 0 : index
    %15 = vector.load %arg8[%c0_10, %c0_11] : memref<8x1xf32, #tpu.memory_space<vmem>>, vector<8x1xf32>
    %cst_12 = arith.constant dense<0.000000e+00> : vector<8xf32>
    %16 = vector.multi_reduction <add>, %14, %cst_12 [1] : vector<8x576xf32> to vector<8xf32>
    %17 = vector.shape_cast %16 : vector<8xf32> to vector<8x1xf32>
    %18 = arith.addf %15, %17 : vector<8x1xf32>
    %c0_13 = arith.constant 0 : index
    %c0_14 = arith.constant 0 : index
    %19 = vector.load %arg8[%c0_13, %c0_14] : memref<8x1xf32, #tpu.memory_space<vmem>>, vector<8x1xf32>
    tpu.vector_store %arg8[%c0_13, %c0_14], %18 {strides = array<i32>} : memref<8x1xf32, #tpu.memory_space<vmem>>, vector<8x1xf32>,
    %c0_i32_15 = arith.constant 0 : i32
    %20 = arith.cmpi eq, %arg1, %c0_i32_15 : i32
    %21 = arith.extui %20 : i1 to i32
    %c0_i32_16 = arith.constant 0 : i32
    %22 = arith.cmpi ne, %21, %c0_i32_16 : i32
    scf.if %22 {
      %c0_17 = arith.constant 0 : index
      %c0_18 = arith.constant 0 : index
      %23 = vector.load %arg8[%c0_17, %c0_18] : memref<8x1xf32, #tpu.memory_space<vmem>>, vector<8x1xf32>
      %cst_19 = arith.constant 0.00173611112 : f32
      %24 = vector.broadcast %cst_19 : f32 to vector<8x1xf32>
      %25 = arith.mulf %23, %24 : vector<8x1xf32>
      %c0_20 = arith.constant 0 : index
      %c0_21 = arith.constant 0 : index
      %26 = vector.load %arg6[%c0_20, %c0_21] : memref<8x1xf32, #tpu.memory_space<vmem>>, vector<8x1xf32>
      %27 = arith.mulf %25, %26 : vector<8x1xf32>
      %cst_22 = arith.constant dense<0.000000e+00> : vector<1xf32>
      %28 = vector.multi_reduction <add>, %27, %cst_22 [0] : vector<8x1xf32> to vector<1xf32>
      %29 = vector.shape_cast %28 : vector<1xf32> to vector<1x1xf32>
      %c0_23 = arith.constant 0 : index
      %30 = memref.load %arg2[%c0_23] : memref<1xi32, #tpu.memory_space<smem>>
      %31 = arith.sitofp %30 : i32 to f32
      %32 = arith.negf %29 : vector<1x1xf32>
      %33 = math.exp %32 : vector<1x1xf32>
      %cst_24 = arith.constant 1.000000e+00 : f32
      %34 = vector.broadcast %cst_24 : f32 to vector<1x1xf32>
      %35 = arith.addf %34, %33 : vector<1x1xf32>
      %36 = arith.divf %34, %35 : vector<1x1xf32>
      %cst_25 = arith.constant 0.000000e+00 : f32
      %37 = vector.broadcast %cst_25 : f32 to vector<1x1xf32>
      %38 = arith.maximumf %29, %37 : vector<1x1xf32>
      %39 = vector.broadcast %31 : f32 to vector<1x1xf32>
      %40 = arith.mulf %29, %39 : vector<1x1xf32>
      %41 = arith.subf %38, %40 : vector<1x1xf32>
      %42 = math.absf %29 : vector<1x1xf32>
      %cst_26 = arith.constant 0.000000e+00 : f32
      %43 = vector.broadcast %cst_26 : f32 to vector<1x1xf32>
      %44 = arith.subf %43, %42 : vector<1x1xf32>
      %45 = math.exp %44 : vector<1x1xf32>
      %46 = math.log1p %45 : vector<1x1xf32>
      %47 = arith.addf %41, %46 : vector<1x1xf32>
      %48 = vector.broadcast %31 : f32 to vector<1x1xf32>
      %49 = arith.mulf %36, %48 : vector<1x1xf32>
      %cst_27 = arith.constant 1.000000e+00 : f32
      %50 = vector.broadcast %cst_27 : f32 to vector<1x1xf32>
      %51 = arith.subf %50, %36 : vector<1x1xf32>
      %cst_28 = arith.constant 1.000000e+00 : f32
      %52 = arith.subf %cst_28, %31 : f32
      %53 = vector.broadcast %52 : f32 to vector<1x1xf32>
      %54 = arith.mulf %51, %53 : vector<1x1xf32>
      %55 = arith.addf %49, %54 : vector<1x1xf32>
      %cst_29 = arith.constant 2.500000e-01 : f32
      %56 = arith.mulf %cst_29, %31 : f32
      %cst_30 = arith.constant 1.000000e+00 : f32
      %57 = arith.subf %cst_30, %31 : f32
      %cst_31 = arith.constant 7.500000e-01 : f32
      %58 = arith.mulf %cst_31, %57 : f32
      %59 = arith.addf %56, %58 : f32
      %cst_32 = arith.constant 1.000000e+00 : f32
      %60 = vector.broadcast %cst_32 : f32 to vector<1x1xf32>
      %61 = arith.subf %60, %55 : vector<1x1xf32>
      %62 = vector.broadcast %59 : f32 to vector<1x1xf32>
      %63 = arith.mulf %62, %47 : vector<1x1xf32>
      %64 = arith.mulf %61, %61 : vector<1x1xf32>
      %65 = arith.mulf %63, %64 : vector<1x1xf32>
      %c0_33 = arith.constant 0 : index
      %c0_34 = arith.constant 0 : index
      %c0_35 = arith.constant 0 : index
      %66 = vector.load %arg7[%c0_33, %c0_34, %c0_35] : memref<1x1x1xf32, #tpu.memory_space<vmem>>, vector<1x1x1xf32>
      %67 = vector.shape_cast %66 : vector<1x1x1xf32> to vector<1x1xf32>
      %68 = vector.shape_cast %65 : vector<1x1xf32> to vector<1x1x1xf32>
      tpu.vector_store %arg7[%c0_33, %c0_34, %c0_35], %68 {strides = array<i32>} : memref<1x1x1xf32, #tpu.memory_space<vmem>>, vector<1x1x1xf32>,
    } else {
    }
    return
  }
  func.func @transform_0(%arg0: i32, %arg1: i32, %arg2: memref<1xi32, #tpu.memory_space<smem>>) -> (i32, i32, i32) {
    %c0_i32 = arith.constant 0 : i32
    %c0_i32_0 = arith.constant 0 : i32
    return %arg0, %c0_i32, %arg1 : i32, i32, i32
  }
  func.func @transform_1(%arg0: i32, %arg1: i32, %arg2: memref<1xi32, #tpu.memory_space<smem>>) -> (i32, i32) {
    %c0_i32 = arith.constant 0 : i32
    %c0_i32_0 = arith.constant 0 : i32
    %c0_i32_1 = arith.constant 0 : i32
    return %c0_i32, %c0_i32_0 : i32, i32
  }
  func.func @transform_2(%arg0: i32, %arg1: i32, %arg2: memref<1xi32, #tpu.memory_space<smem>>) -> (i32, i32) {
    %c0_i32 = arith.constant 0 : i32
    %c0_i32_0 = arith.constant 0 : i32
    %c0_i32_1 = arith.constant 0 : i32
    return %c0_i32, %c0_i32_0 : i32, i32
  }
  func.func @transform_3(%arg0: i32, %arg1: i32, %arg2: memref<1xi32, #tpu.memory_space<smem>>) -> (i32, i32) {
    %c0_i32 = arith.constant 0 : i32
    %c0_i32_0 = arith.constant 0 : i32
    %c0_i32_1 = arith.constant 0 : i32
    return %c0_i32, %c0_i32_0 : i32, i32
  }
  func.func @transform_4(%arg0: i32, %arg1: i32, %arg2: memref<1xi32, #tpu.memory_space<smem>>) -> (i32, i32, i32) {
    %c0_i32 = arith.constant 0 : i32
    %c0_i32_0 = arith.constant 0 : i32
    %c0_i32_1 = arith.constant 0 : i32
    return %arg0, %c0_i32, %c0_i32_0 : i32, i32, i32
  }
}

</mosaic_0001>

<bundles_post_ra>
// kernel: tpu_custom_call.1
= control target key start
LH: loop header
LB: loop body
LE: loop exit
PB: predicated region body
PF: predicated region fallthrough
CT: control target
= control target key end

     0   :  { %s1078_s0 = inlined_call_operand.<no memory space> [shape: s32[1], index: 0, kind: input, shape index: {}]   ;;  %s1079_s1 = inlined_call_operand.hbm [shape: f32[2,32,576], index: 1, kind: input, shape index: {}]   ;;  %s1080_s2 = inlined_call_operand.vmem [shape: bf16[16,32], index: 2, kind: input, shape index: {}]   ;;  %s1081_s3 = inlined_call_operand.vmem [shape: bf16[8,16], index: 3, kind: input, shape index: {}]   ;;  %s1082_s4 = inlined_call_operand.vmem [shape: f32[8,1], index: 4, kind: input, shape index: {}]   ;;  %s1083_s5 = inlined_call_operand.vmem [shape: f32[2,1,1], index: 5, kind: output, shape index: {}]  }
   0x1   :  { %10 = sst [smem:[#allocation4]] %s1078_s0 }
   0x2   :  { %11 = vsyncpa [#allocation6], 0 }
   0x3   :  { %13 = vsyncpa [#allocation6 + $0x1], 0  ;;  %s921_s20 = smov 0   ;;  %s923_s21 = smov 0  }
   0x4   :  { %s925_s22 = smov 0   ;;  %s927_s23 = smov 0  }
   0x5   :  { %s929_s24 = smov 0   ;;  %s931_s25 = smov 0  }
   0x6 LB: > { %s693_s0 = sadd.s32 4294967295, %s880_s25   ;;  %s31_s26 = sadd.s32 1, %s876_s24  ;;  %s880_s25 = sphi %s931_s25, %s19_s25   ;;  %s876_s24 = sphi %s929_s24, %s1090_s24   ;;  %s872_s23 = sphi %s927_s23, %s1089_s23   ;;  %s868_s22 = sphi %s925_s22, %s1088_s22   ;;  %s864_s21 = sphi %s923_s21, %s1087_s21   ;;  %s860_s20 = sphi %s921_s20, %s1086_s20  }
   0x7   : > { %p33_p0 = scmp.ge.s32.totalorder %s31_s26, 2  ;;  %s40_s27 = sadd.s32 1, %s868_s22 }
   0x8   : > { %p47_p1 = scmp.ne.s32.totalorder %s868_s22, %s864_s21  ;;  %p48_p2 = scmp.eq.s32.totalorder %s880_s25, 0 }
   0x9   : > { %s1092_s26 = smov (%p33_p0, %s31_s26), 0  ;;  %p53_p4 = scmp.ne.s32.totalorder %s864_s21, %s860_s20 }
   0xa   : > { %p49_p3 = por %p48_p2, %p47_p1  ;;  %s35_s28 = ssub.s32 %s876_s24, %s1092_s26 }
   0xb   : > { %p54_p5 = scmp.eq.s32.totalorder %s693_s0, 0  ;;  %p38_p6 = scmp.eq.s32.totalorder %s35_s28, 0 }
   0xc   : > { %p737_p8 = scmp.lt.s32.totalorder %s880_s25, 2  ;;  %s175_s6 = sand.u32 1, %s868_s22  }
   0xd   : > { %p960_p7 = por %p54_p5, %p53_p4  ;;  %s729_s7 = smul.u32 2560, %s876_s24 }
   0xe   : > { %s966_s30 = scalar_select %p38_p6, %s868_s22, %s40_s27  }
   0xf   : > { %s728_s8 = smul.u32 160, %s175_s6  ;;  %s973_s11 = scalar_lea.hbm %s1079_s1, %s729_s7 }
  0x10   : > { %p975_p9 = pnand %p737_p8, %p49_p3  ;;  %s981_s15 = scalar_lea.sflag [#allocation6], %s175_s6 }
  0x11   : > { %s179_s13 = scalar_lea.vmem [#allocation5], %s728_s8  ;;  %s800_s16 = scalar_lea.hbm %s973_s11, 2560 }
  0x12   : > { %s188_s14 = sshll.u32 %s179_s13, 4  ;;  %p801_p10 = scmp.ne.s32.totalorder %s973_s11, %s800_s16  ;;  %s979_s14 = int_to_ptr.vmem [resolvable:$true] %s188_s14 }
  0x13   : > { %p802_p11 = pneg %p975_p9  ;;  %s805_s19 = scalar_lea.hbm %s1079_s1, 5120 }
  0x14   : > { %p806_p0 = scmp.lt.u32.totalorder %s973_s11, %s1079_s1  ;;  %p807_p1 = scmp.lt.u32.totalorder %s805_s19, %s800_s16 }
  0x15   : > { %p803_p12 = pnand %p802_p11, %p801_p10  ;;  %p809_p3 = scmp.lt.u32.totalorder %s800_s16, %s973_s11 }
  0x16   : > { %p808_p2 = por %p807_p1, %p806_p0 }
  0x17   : > { %p804_p13 = pneg %p803_p12 }
  0x18   : > { %p810_p4 = por %p809_p3, %p808_p2 }
  0x1a   : > { %p811_p5 = pnand %p810_p4, %p804_p13 }
  0x1c   : > { %814 = shalt.err (!%p811_p5)
}
  0x1d   : > { %s815_s27 = scalar_lea.vmem %s979_s14, 2560  ;;  %s882_s28 = smov [#allocation5]  }
  0x1e   : > { %p816_p6 = scmp.ne.s32.totalorder %s979_s14, %s815_s27  ;;  %s820_s6 = sshll.u32 %s882_s28, 4  ;;  %s821_s6 = int_to_ptr.vmem [resolvable:$false] %s820_s6 }
  0x1f   : > { %s822_s7 = scalar_lea.vmem %s821_s6, 5120  ;;  %p823_p12 = scmp.lt.s32.totalorder %s979_s14, %s821_s6 }
  0x20   : > { %p818_p8 = pnand %p816_p6, %p802_p11  ;;  %p824_p0 = scmp.lt.s32.totalorder %s822_s7, %s815_s27 }
  0x22   : > { %p819_p10 = pneg %p818_p8  ;;  %p825_p1 = por %p824_p0, %p823_p12 }
  0x24   : > { %p826_p2 = pnand %p825_p1, %p819_p10 }
  0x26   : > { %829 = shalt.err (!%p826_p2)
}
  0x27   : > { %s883_s8 = smov 640   ;;  %s884_s9 = smov 40  }
  0x28   : > { %736 = dma.hbm_to_vmem [thread:$0]  (!%p975_p9), %s973_s11, 2560, %s979_s14, %s981_s15, %s883_s8, %s883_s8, %s884_s9  }
  0x29   : > { %p698_p11 = scmp.ge.s32.totalorder %s880_s25, 1  ;;  %p196_p13 = scmp.lt.s32.totalorder %s880_s25, 3 }
  0x2b   : > { %p197_p3 = pnand %p698_p11, %p196_p13 }
  0x2c   : > { %s202_s10 = sand.u32 (!%p197_p3), 1, %s864_s21  }
  0x2d   : > { %200 = sbr.rel (%p197_p3) target bundleno = 721 (0x2d1), region = 36  ;;  %s203_s16 = scalar_lea.sflag (!%p197_p3), [#allocation6], %s202_s10 }
  0x2e   : > { %s730_s13 = smul.u32 (!%p197_p3), 160, %s202_s10 }
  0x30   : > { %s1012_s17 = scalar_lea.vmem (!%p197_p3), [#allocation5], %s730_s13 }
  0x34   : > { %855 = dma.done.wait (%p960_p7), %s203_s16, 2560  }
  0x35   : > { %857 = vsyncadd (%p960_p7), %s203_s16, 4294964736  ;;  %v885_v0 = vmov 0   ;;  %v241_v1 = vld [vmem:[%s1012_s17 + $0x8] sm:$0xff]  ;;  %v246_v2 = vld [vmem:[%s1012_s17 + $0x30] sm:$0xff]  ;;  %vm277_vm0 = vcmask 261120   ;;  %v886_v29 = vmov 0.0  }
  0x36   : > { %313 = vmatprep.mubr.bf16.mxu0 %v885_v0  ;;  %356 = vmatprep.mubr.bf16.mxu1 %v885_v0  ;;  %v240_v3 = vld [vmem:[%s1012_s17] sm:$0xff]  ;;  %v261_v4 = vpack.c.bf16 %v246_v2, %v241_v1  ;;  %v245_v5 = vld [vmem:[%s1012_s17 + $0x28] sm:$0xff]  ;;  %v243_v6 = vld [vmem:[%s1012_s17 + $0x18] sm:$0xff]  ;;  %vm887_vm1 = vmmov 0   ;;  %vm424_vm2 = vcmask 130048   ;;  %vm238_vm3 = vcmask 7168  }
  0x37   : > { %v248_v7 = vld [vmem:[%s1012_s17 + $0x40] sm:$0xff]  ;;  %v260_v8 = vpack.c.bf16 %v245_v5, %v240_v3  ;;  %v242_v10 = vld [vmem:[%s1012_s17 + $0x10] sm:$0xff]  ;;  %v247_v11 = vld [vmem:[%s1012_s17 + $0x38] sm:$0xff]  ;;  %239 = vst.msk [vmem:[#allocation2] sm:$0xff] %vm238_vm3, %v886_v29  ;;  %vm559_vm4 = vcmask 523264   ;;  %s581_s19 = sld [smem:[#allocation4]] }
  0x38   : > { %v263_v9 = vpack.c.bf16 %v248_v7, %v243_v6  ;;  %v251_v12 = vld [vmem:[%s1012_s17 + $0x58] sm:$0xff]  ;;  %281 = vmatprep.subr.bf16.mxu0 %v261_v4  ;;  %v262_v13 = vpack.c.bf16 %v247_v11, %v242_v10  ;;  %v256_v14 = vld [vmem:[%s1012_s17 + $0x80] sm:$0xff]  ;;  %v250_v15 = vld [vmem:[%s1012_s17 + $0x50] sm:$0xff]  ;;  %p230_p7 = scmp.lt.s32.totalorder %s872_s23, 1  ;;  %vm621_vm6 = vcmask 0  }
  0x39   : > { %v255_v16 = vld [vmem:[%s1012_s17 + $0x78] sm:$0xff]  ;;  %282 = vmatpush1.bf16.msra.mxu0 %v260_v8  ;;  %v266_v17 = vpack.c.bf16 %v256_v14, %v251_v12  ;;  %v253_v19 = vld [vmem:[%s1012_s17 + $0x68] sm:$0xff]  ;;  %v258_v20 = vld [vmem:[%s1012_s17 + $0x90] sm:$0xff] }
  0x3a   : > { %324 = vmatprep.subr.bf16.mxu1 %v263_v9  ;;  %v265_v18 = vpack.c.bf16 %v255_v16, %v250_v15  ;;  %v252_v21 = vld [vmem:[%s1012_s17 + $0x60] sm:$0xff]  ;;  %v268_v22 = vpack.c.bf16 %v258_v20, %v253_v19  ;;  %v257_v23 = vld [vmem:[%s1012_s17 + $0x88] sm:$0xff]  ;;  %v791_v27 = vld [vmem:[%s1080_s2] sm:$0xff]   ;;  %s1094_s23 = smov (!%p230_p7, %s872_s23), 1 }
  0x3b   : > { %325 = vmatpush1.bf16.msra.mxu1 %v262_v13  ;;  %283 = vmatprep.subr.bf16.mxu0 %v266_v17  ;;  %v267_v24 = vpack.c.bf16 %v257_v23, %v252_v21  ;;  %v244_v25 = vld [vmem:[%s1012_s17 + $0x20] sm:$0xff]  ;;  %v249_v26 = vld [vmem:[%s1012_s17 + $0x48] sm:$0xff]  ;;  %v254_v30 = vld [vmem:[%s1012_s17 + $0x70] sm:$0xff]  ;;  %s232_s9 = scalar_lea.vmem %s1083_s5, %s1094_s23 }
  0x3c   : > { %326 = vmatprep.subr.bf16.mxu1 %v268_v22  ;;  %v264_v28 = vpack.c.bf16 %v249_v26, %v244_v25  ;;  %v259_v31 = vld [vmem:[%s1012_s17 + $0x98] sm:$0xff] }
  0x3d   : > { %284 = vmatpush1.bf16.msra.mxu0 %v265_v18  ;;  %v269_v32 = vpack.c.bf16 %v259_v31, %v254_v30  ;;  %v423_v56 = vld [vmem:[%s1081_s3] sm:$0xf]  ;;  %s582_s20 = scvt.s32.f32 %s581_s19 }
  0x3e   : > { %714 = vmatprep.subr.bf16.mxu0 %v886_v29  ;;  %v555_v19 = vld [vmem:[#allocation2] sm:$0xff] }
  0x3f   : > { %327 = vmatpush1.bf16.msra.mxu1 %v267_v24  ;;  %v572_v23 = vld [vmem:[%s1082_s4] sm:$0xff]  ;;  %s609_s0 = ssub.f32 1.0, %s582_s20  ;;  %s613_s27 = smul.f32 0.25, %s582_s20 }
  0x40   : > { %700 = vmatmul.mubr.msk.bf16.vlgmr.msra.gmra.mrb[0].mxu0 %vm277_vm0, %v791_v27 }
  0x41   : > { %715 = vmatpush3.bf16.msra.mxu0 %v264_v28  ;;  %718 = vmatprep.mubr.msk.bf16.mxu0 %vm887_vm1, %v886_v29  ;;  %s614_s28 = smul.f32 0.75, %s609_s0 }
  0x42   : > { %701 = vmatmul.mubr.msk.bf16.vlgmr.msra.gmra.mrb[0].mxu1 %vm277_vm0, %v791_v27  ;;  %716 = vmatprep.subr.bf16.mxu0 %v886_v29 }
  0x43   : > { %460 = vmatprep.mubr.bf16.mxu1 %v885_v0  ;;  %s615_s6 = sadd.f32 %s614_s28, %s613_s27 }
  0x45   : > { %717 = vmatpush3.bf16.msra.mxu0 %v269_v32 }
  0x48   : > { %719 = vmatmul.mubr.msk.bf16.vlgmr.msra.gmra.mrb[4].mxu0 %vm277_vm0, %v791_v27 }
  0x49   : > { %501 = vmatprep.mubr.bf16.mxu0 %v885_v0 }
 0x113   : > { %v315_v33 = vpop.f32.mrb[0].mxu0 }
 0x114   : > { %v317_v34 = vpop.f32.mrb[1].mxu0  ;;  %v408_v39 = vmax.f32 %v315_v33, 0.0 }
 0x115   : > { %v358_v35 = vpop.f32.mrb[0].mxu1  ;;  %v319_v37 = vpop.f32.mrb[2].mxu0  ;;  %v409_v44 = vmax.f32 %v317_v34, 0.0 }
 0x116   : > { %v410_v36 = vmax.f32 %v358_v35, 0.0  ;;  %v360_v38 = vpop.f32.mrb[1].mxu1  ;;  %v413_v40 = vmax.f32 %v319_v37, 0.0  ;;  %v321_v42 = vpop.f32.mrb[3].mxu0 }
 0x117   : > { %v411_v41 = vmax.f32 %v360_v38, 0.0  ;;  %v362_v43 = vpop.f32.mrb[2].mxu1  ;;  %v414_v45 = vmax.f32 %v321_v42, 0.0  ;;  %v590_v42 = vstv %s582_s20 }
 0x118   : > { %v415_v46 = vmax.f32 %v362_v43, 0.0  ;;  %v364_v47 = vpop.f32.mrb[3].mxu1  ;;  %v418_v48 = vpack.c.bf16 %v413_v40, %v408_v39 }
 0x119   : > { %v416_v49 = vmax.f32 %v364_v47, 0.0  ;;  %v419_v50 = vpack.c.bf16 %v414_v45, %v409_v44  ;;  %v610_v44 = vstv %s609_s0 }
 0x11a   : > { %v420_v51 = vpack.c.bf16 %v415_v46, %v410_v36 }
 0x11b   : > { %v421_v52 = vpack.c.bf16 %v416_v49, %v411_v41  ;;  %v401_v53 = vpop.f32.mrb[4].mxu0  ;;  %428 = vmatprep.subr.bf16.mxu1 %v419_v50 }
 0x11c   : > { %v412_v54 = vmax.f32 %v401_v53, 0.0  ;;  %v720_v55 = vpop.f32.mrb[5].mxu0  ;;  %429 = vmatpush1.bf16.msra.mxu1 %v418_v48 }
 0x11d   : > { %469 = vmatprep.subr.bf16.mxu0 %v421_v52  ;;  %v404_v57 = vpop.f32.mrb[6].mxu0  ;;  %722 = vmatprep.subr.bf16.mxu1 %v886_v29 }
 0x11e   : > { %470 = vmatpush1.bf16.msra.mxu0 %v420_v51  ;;  %v417_v58 = vmax.f32 %v404_v57, 0.0  ;;  %v721_v59 = vpop.f32.mrb[7].mxu0 }
 0x11f   : > { %703 = vmatmul.mubr.msk.bf16.vlgmr.msra.gmra.mrb[4].mxu1 %vm424_vm2, %v423_v56  ;;  %v617_v59 = vstv %s615_s6 }
 0x120   : > { %v422_v60 = vpack.c.bf16 %v417_v58, %v412_v54  ;;  %724 = vmatprep.mubr.msk.bf16.mxu1 %vm887_vm1, %v886_v29 }
 0x121   : > { %704 = vmatmul.mubr.msk.bf16.vlgmr.msra.gmra.mrb[8].mxu0 %vm424_vm2, %v423_v56 }
 0x122   : > { %723 = vmatpush3.bf16.msra.mxu1 %v422_v60 }
 0x127   : > { %725 = vmatmul.mubr.msk.bf16.vlgmr.msra.gmra.mrb[8].mxu1 %vm424_vm2, %v423_v56 }
 0x1f2   : > { %v462_v61 = vpop.f32.mrb[4].mxu1 }
 0x1f3   : > { %v550_v62 = vmax.f32 %v462_v61, 0.0  ;;  %v464_v63 = vpop.f32.mrb[5].mxu1 }
 0x1f4   : > { %v503_v0 = vpop.f32.mrb[8].mxu0  ;;  %v551_v1 = vmax.f32 %v464_v63, 0.0  ;;  %v466_v2 = vpop.f32.mrb[6].mxu1 }
 0x1f5   : > { %v552_v3 = vmax.f32 %v503_v0, 0.0  ;;  %v505_v4 = vpop.f32.mrb[9].mxu0  ;;  %v467_v5 = vpop.f32.mrb[7].mxu1 }
 0x1f6   : > { %v507_v6 = vpop.f32.mrb[10].mxu0  ;;  %v556_v7 = vadd.f32 %v551_v1, %v550_v62  ;;  %v553_v8 = vmax.f32 %v505_v4, 0.0 }
 0x1f7   : > { %v508_v9 = vpop.f32.mrb[11].mxu0 }
 0x1f8   : > { %v557_v10 = vadd.f32 %v556_v7, %v552_v3 }
 0x1fa   : > { %v544_v11 = vpop.f32.mrb[8].mxu1  ;;  %v558_v12 = vadd.f32 %v557_v10, %v553_v8 }
 0x1fb   : > { %v554_v13 = vmax.f32 %v544_v11, 0.0  ;;  %v726_v14 = vpop.f32.mrb[9].mxu1 }
 0x1fc   : > { %v547_v15 = vpop.f32.mrb[10].mxu1 }
 0x1fd   : > { %v727_v16 = vpop.f32.mrb[11].mxu1  ;;  %v560_v17 = vsel %vm559_vm4, %v554_v13, 0.0 }
 0x1fe   : > { %v561_v18 = vadd.f32 %v560_v17, %v558_v12 }
 0x200   : > { %562 = vadd.xlane.f32.xlu0 %v561_v18 }
 0x28d   : > { %v563_v20 = vpop.xlane.xlu0 %562 }
 0x28e   : > { %v564_v21 = vadd.f32 %v563_v20, %v555_v19 }
 0x290   : > { %566 = vst.msk [vmem:[#allocation2] sm:$0xff] %vm238_vm3, %v564_v21 }
 0x297   : > { %v570_v22 = vld [vmem:[#allocation2] sm:$0xff] }
 0x298   : > { %v571_v24 = vmul.f32 0.0017361111, %v570_v22 }
 0x29a   : > { %v573_v25 = vmul.f32 %v572_v23, %v571_v24 }
 0x29c   : > { %v574_v26 = vsel %vm238_vm3, %v573_v25, 0.0 }
 0x29d   : > { %v575_v27 = vrot.slane %v574_v26, 4 }
 0x29f   : > { %v576_v28 = vadd.f32 %v575_v27, %v574_v26 }
 0x2a1   : > { %v577_v29 = vrot.slane %v576_v28, 2 }
 0x2a3   : > { %v578_v30 = vadd.f32 %v577_v29, %v576_v28 }
 0x2a5   : > { %v579_v31 = vrot.slane %v578_v30, 1 }
 0x2a7   : > { %v580_v32 = vadd.f32 %v579_v31, %v578_v30 }
 0x2a9   : > { %v706_v33 = vmul.f32 -1.442695, %v580_v32  ;;  %v593_v34 = vand.u32 2147483647, %v580_v32  ;;  %v589_v47 = vmax.f32 %v580_v32, 0.0  ;;  %v591_v48 = vmul.f32 %v590_v42, %v580_v32 }
 0x2ab   : > { %792 = vpow2.f32 %v706_v33  ;;  %v594_v35 = vsub.f32 0.0, %v593_v34  ;;  %v592_v56 = vsub.f32 %v589_v47, %v591_v48 }
 0x2ad   : > { %v595_v36 = vmul.f32 1.442695, %v594_v35 }
 0x2af   : > { %794 = vpow2.f32 %v595_v36 }
 0x2b5   : > { %v793_v37 = vpop.eup %792 }
 0x2b6   : > { %v586_v38 = vadd.f32 1.0, %v793_v37 }
 0x2b8   : > { %796 = vrcp.f32 %v586_v38 }
 0x2b9   : > { %v795_v39 = vpop.eup %794 }
 0x2ba   : > { %v597_v40 = vadd.f32 1.0, %v795_v39  ;;  %v600_v41 = vmul.f32 -0.5, %v795_v39  ;;  %v603_v49 = vand.u32 2147483647, %v795_v39 }
 0x2bc   : > { %798 = vlog2.f32 %v597_v40  ;;  %v601_v45 = vadd.f32 1.0, %v600_v41  ;;  %vm604_vm5 = vcmp.lt.f32.partialorder %v603_v49, 0.0004427343 }
 0x2be   : > { %v602_v54 = vmul.f32 %v795_v39, %v601_v45 }
 0x2c2   : > { %v797_v43 = vpop.eup %796 }
 0x2c3   : > { %v608_v46 = vsub.f32 1.0, %v797_v43  ;;  %v607_v50 = vmul.f32 %v797_v43, %v590_v42 }
 0x2c5   : > { %v611_v51 = vmul.f32 %v610_v44, %v608_v46 }
 0x2c6   : > { %v799_v52 = vpop.eup %798 }
 0x2c7   : > { %v599_v53 = vmul.f32 0.6931472, %v799_v52  ;;  %v612_v55 = vadd.f32 %v611_v51, %v607_v50 }
 0x2c9   : > { %v605_v57 = vsel %vm604_vm5, %v602_v54, %v599_v53  ;;  %v616_v58 = vsub.f32 1.0, %v612_v55 }
 0x2ca   : > { %v606_v60 = vadd.f32 %v605_v57, %v592_v56 }
 0x2cb   : > { %v619_v61 = vmul.f32 %v616_v58, %v616_v58 }
 0x2cc   : > { %v618_v62 = vmul.f32 %v617_v59, %v606_v60 }
 0x2ce   : > { %v620_v63 = vmul.f32 %v619_v61, %v618_v62 }
 0x2d0   : > { %622 = vst.msk [vmem:[%s232_s9] sm:$0x1] %vm621_vm6, %v620_v63 }
 0x2d1 PF: > { %s19_s25 = sadd.s32 1, %s880_s25   ;;  %s1086_s20 = smov %s864_s21 }
 0x2d2   : > { %p16_p9 = scmp.ge.s32.totalorder %s19_s25, 4   ;;  %s1087_s21 = smov %s868_s22 }
 0x2d3   : > { %s1088_s22 = smov %s966_s30  ;;  %s1089_s23 = smov %s876_s24 }
 0x2d4   : > { %s1090_s24 = smov %s1092_s26  ;;  %18 = sbr.rel (!%p16_p9) target bundleno = 6 (0x6), region = 84 }
 0x2db   :  { %640 = vsyncpa [#allocation6], 1 }
 0x2dc   :  { %642 = vsyncpa [#allocation6 + $0x1], 1 }

</bundles_post_ra>
